<compile_context>
chip_gen: v7x
topology: tpu7x:2x2x1
jax: 0.10.0
libtpu: 0.0.40
codegen_flags: <defaults>
</compile_context>

<pallas_src>
import jax
import jax.numpy as jnp
from jax.experimental import pallas as pl
from jax.experimental.pallas import tpu as pltpu


def _round_up(x, m):
    return ((x + m - 1) // m) * m


def _dueling_kernel(x_ref, w1_ref, b1_ref, wq_ref, bq_ref, q_ref):
    # hidden layer + relu                                   (tb, hidden)
    h = jnp.dot(x_ref[...], w1_ref[...],
                preferred_element_type=jnp.float32) + b1_ref[...]
    h = jnp.maximum(h, 0.0)
    # folded dueling head (value head + combine already baked into W_q, b_q)
    q = jnp.dot(h, wq_ref[...],
                preferred_element_type=jnp.float32) + bq_ref[...]
    q_ref[...] = q.astype(q_ref.dtype)


def fold_dueling_head(wa, ba, wv, bv):
    """Fold value head + dueling combine into one linear head (exact algebra).

        W_q[:, j] = wa[:, j] - mean_k wa[:, k] + wv[:, 0]
        b_q[j]    = ba[j]    - mean_k ba[k]    + bv

    Run this once per parameter update (not per forward call).
    """
    w_q = wa - jnp.mean(wa, axis=1, keepdims=True) + wv      # (hidden, n_out)
    b_q = ba - jnp.mean(ba, axis=1, keepdims=True) + bv      # (1, n_out)
    return w_q, b_q


def dueling_q(x, w1, b1, w_q, b_q, *, block_b=2048):
    """q = relu(x @ W1 + b1) @ W_q + b_q   (weights stored as [in, out])."""
    B, num_inputs = x.shape
    hidden = w1.shape[1]
    num_outputs = w_q.shape[1]

    # ---- batch tiling: big tiles, no explicit padding of x ----
    tb = _round_up(min(block_b, B), 8)
    # Give both v7x TensorCores work when the batch is big enough to matter.
    if B >= 128 and pl.cdiv(B, tb) < 2:
        tb = _round_up(pl.cdiv(B, 2), 8)
    grid = (pl.cdiv(B, tb),)

    flops = 2 * B * (num_inputs * hidden + hidden * num_outputs)
    bytes_accessed = 4 * (B * (num_inputs + num_outputs)
                          + num_inputs * hidden + hidden * num_outputs
                          + hidden + num_outputs)

    return pl.pallas_call(
        _dueling_kernel,
        out_shape=jax.ShapeDtypeStruct((B, num_outputs), jnp.float32),
        grid=grid,
        in_specs=[
            pl.BlockSpec((tb, num_inputs), lambda i: (i, 0)),       # x tile
            pl.BlockSpec((num_inputs, hidden), lambda i: (0, 0)),   # W1 (VMEM-resident)
            pl.BlockSpec((1, hidden), lambda i: (0, 0)),            # b1 (resident)
            pl.BlockSpec((hidden, num_outputs), lambda i: (0, 0)),  # W_q (resident)
            pl.BlockSpec((1, num_outputs), lambda i: (0, 0)),       # b_q (resident)
        ],
        # Full-dim last axis (= num_outputs) -> legal narrow block; avoids the
        # 128-lane pad + wrapper slice (32x HBM write amplification).
        out_specs=pl.BlockSpec((tb, num_outputs), lambda i: (i, 0)),
        compiler_params=pltpu.CompilerParams(
            dimension_semantics=("parallel",)),
        cost_estimate=pl.CostEstimate(
            flops=flops, transcendentals=0, bytes_accessed=bytes_accessed),
    )(x, w1, b1, w_q, b_q)


def xavier_uniform(key, fan_in, fan_out):
    # matches torch.nn.init.xavier_uniform_ (gain=1); stored as [in, out]
    limit = (6.0 / (fan_in + fan_out)) ** 0.5
    return jax.random.uniform(key, (fan_in, fan_out), jnp.float32,
                              minval=-limit, maxval=limit)


if __name__ == "__main__":
    num_inputs, num_outputs, batch = 32, 4, 8

    key = jax.random.PRNGKey(0)
    k_x, k_w1, k_b1, k_wa, k_ba, k_wv, k_bv = jax.random.split(key, 7)

    x = jax.random.normal(k_x, (batch, num_inputs), jnp.float32)

    # parameters (weights xavier-uniform as in __init__, biases small uniform
    # like torch's default Linear bias init) — all deterministic from the key.
    w1 = xavier_uniform(k_w1, num_inputs, 128)
    b1 = jax.random.uniform(k_b1, (1, 128), jnp.float32,
                            minval=-1.0 / num_inputs ** 0.5,
                            maxval=1.0 / num_inputs ** 0.5)
    wa = xavier_uniform(k_wa, 128, num_outputs)
    ba = jax.random.uniform(k_ba, (1, num_outputs), jnp.float32,
                            minval=-1.0 / 128 ** 0.5, maxval=1.0 / 128 ** 0.5)
    wv = xavier_uniform(k_wv, 128, 1)
    bv = jax.random.uniform(k_bv, (1, 1), jnp.float32,
                            minval=-1.0 / 128 ** 0.5, maxval=1.0 / 128 ** 0.5)

    # Fold the dueling head once (would be cached across forward calls).
    w_q, b_q = fold_dueling_head(wa, ba, wv, bv)

    q = dueling_q(x, w1, b1, w_q, b_q)
    q = jax.block_until_ready(q)

    # pure-JAX reference (original, un-folded formulation)
    h_ref = jnp.maximum(x @ w1 + b1, 0.0)
    adv_ref = h_ref @ wa + ba
    val_ref = h_ref @ wv + bv
    q_ref = val_ref + (adv_ref - adv_ref.mean(axis=1, keepdims=True))

    assert q.shape == (batch, num_outputs), f"bad shape {q.shape}"
    assert jnp.allclose(q, q_ref, atol=1e-5, rtol=1e-5), "mismatch vs reference"

    print("KERNEL_OK")
</pallas_src>

<mosaic_0001>
module attributes {stable_mosaic.version = 11 : i64} {
  func.func @_dueling_kernel(%arg0: i32, %arg1: memref<8x32xf32, #tpu.memory_space<vmem>>, %arg2: memref<32x128xf32, #tpu.memory_space<vmem>>, %arg3: memref<1x128xf32, #tpu.memory_space<vmem>>, %arg4: memref<128x4xf32, #tpu.memory_space<vmem>>, %arg5: memref<1x4xf32, #tpu.memory_space<vmem>>, %arg6: memref<8x4xf32, #tpu.memory_space<vmem>>) attributes {dimension_semantics = [#tpu.dimension_semantics<parallel>], iteration_bounds = array<i64: 1>, scalar_prefetch = 0 : i64, scratch_operands = 0 : i64, tpu.core_type = #tpu.core_type<tc>, window_params = [{transform_indices = @transform_0, window_bounds = array<i64: 8, 32>}, {pipeline_mode = #tpu.pipeline_mode<synchronous>, transform_indices = @transform_1, window_bounds = array<i64: 32, 128>}, {pipeline_mode = #tpu.pipeline_mode<synchronous>, transform_indices = @transform_2, window_bounds = array<i64: 1, 128>}, {pipeline_mode = #tpu.pipeline_mode<synchronous>, transform_indices = @transform_3, window_bounds = array<i64: 128, 4>}, {pipeline_mode = #tpu.pipeline_mode<synchronous>, transform_indices = @transform_4, window_bounds = array<i64: 1, 4>}, {transform_indices = @transform_5, window_bounds = array<i64: 8, 4>}]} {
    %c0 = arith.constant 0 : index
    %c0_0 = arith.constant 0 : index
    %0 = vector.load %arg1[%c0, %c0_0] : memref<8x32xf32, #tpu.memory_space<vmem>>, vector<8x32xf32>
    %c0_1 = arith.constant 0 : index
    %c0_2 = arith.constant 0 : index
    %1 = vector.load %arg2[%c0_1, %c0_2] : memref<32x128xf32, #tpu.memory_space<vmem>>, vector<32x128xf32>
    %cst = arith.constant dense<0.000000e+00> : vector<8x128xf32>
    %2 = tpu.matmul %0, %1, %cst {dimension_numbers = #tpu.dot_dimension_numbers<[1], [0], [0], [1], [0, 0, 1, 1], [], []>} : vector<8x32xf32>, vector<32x128xf32>, vector<8x128xf32> -> vector<8x128xf32>
    %c0_3 = arith.constant 0 : index
    %c0_4 = arith.constant 0 : index
    %3 = vector.load %arg3[%c0_3, %c0_4] : memref<1x128xf32, #tpu.memory_space<vmem>>, vector<1x128xf32>
    %4 = vector.broadcast %3 : vector<1x128xf32> to vector<8x128xf32>
    %5 = arith.addf %2, %4 : vector<8x128xf32>
    %cst_5 = arith.constant 0.000000e+00 : f32
    %6 = vector.broadcast %cst_5 : f32 to vector<8x128xf32>
    %7 = arith.maximumf %5, %6 : vector<8x128xf32>
    %c0_6 = arith.constant 0 : index
    %c0_7 = arith.constant 0 : index
    %8 = vector.load %arg4[%c0_6, %c0_7] : memref<128x4xf32, #tpu.memory_space<vmem>>, vector<128x4xf32>
    %cst_8 = arith.constant dense<0.000000e+00> : vector<8x4xf32>
    %9 = tpu.matmul %7, %8, %cst_8 {dimension_numbers = #tpu.dot_dimension_numbers<[1], [0], [0], [1], [0, 0, 1, 1], [], []>} : vector<8x128xf32>, vector<128x4xf32>, vector<8x4xf32> -> vector<8x4xf32>
    %c0_9 = arith.constant 0 : index
    %c0_10 = arith.constant 0 : index
    %10 = vector.load %arg5[%c0_9, %c0_10] : memref<1x4xf32, #tpu.memory_space<vmem>>, vector<1x4xf32>
    %11 = vector.broadcast %10 : vector<1x4xf32> to vector<8x4xf32>
    %12 = arith.addf %9, %11 : vector<8x4xf32>
    %c0_11 = arith.constant 0 : index
    %c0_12 = arith.constant 0 : index
    %13 = vector.load %arg6[%c0_11, %c0_12] : memref<8x4xf32, #tpu.memory_space<vmem>>, vector<8x4xf32>
    tpu.vector_store %arg6[%c0_11, %c0_12], %12 {strides = array<i32>} : memref<8x4xf32, #tpu.memory_space<vmem>>, vector<8x4xf32>,
    return
  }
  func.func @transform_0(%arg0: i32) -> (i32, i32) {
    %c0_i32 = arith.constant 0 : i32
    %c0_i32_0 = arith.constant 0 : i32
    return %arg0, %c0_i32 : i32, i32
  }
  func.func @transform_1(%arg0: i32) -> (i32, i32) {
    %c0_i32 = arith.constant 0 : i32
    %c0_i32_0 = arith.constant 0 : i32
    %c0_i32_1 = arith.constant 0 : i32
    return %c0_i32, %c0_i32_0 : i32, i32
  }
  func.func @transform_2(%arg0: i32) -> (i32, i32) {
    %c0_i32 = arith.constant 0 : i32
    %c0_i32_0 = arith.constant 0 : i32
    %c0_i32_1 = arith.constant 0 : i32
    return %c0_i32, %c0_i32_0 : i32, i32
  }
  func.func @transform_3(%arg0: i32) -> (i32, i32) {
    %c0_i32 = arith.constant 0 : i32
    %c0_i32_0 = arith.constant 0 : i32
    %c0_i32_1 = arith.constant 0 : i32
    return %c0_i32, %c0_i32_0 : i32, i32
  }
  func.func @transform_4(%arg0: i32) -> (i32, i32) {
    %c0_i32 = arith.constant 0 : i32
    %c0_i32_0 = arith.constant 0 : i32
    %c0_i32_1 = arith.constant 0 : i32
    return %c0_i32, %c0_i32_0 : i32, i32
  }
  func.func @transform_5(%arg0: i32) -> (i32, i32) {
    %c0_i32 = arith.constant 0 : i32
    %c0_i32_0 = arith.constant 0 : i32
    return %arg0, %c0_i32 : i32, i32
  }
}

</mosaic_0001>

<bundles_post_ra>
// kernel: tpu_custom_call.1
= control target key start
LH: loop header
LB: loop body
LE: loop exit
PB: predicated region body
PF: predicated region fallthrough
CT: control target
= control target key end

     0   :  { %v310_v0 = vmov 0.0|0.0   ;;  %vm311_vm0 = vmmov 0   ;;  %v312_v4 = vmov 0.0   ;;  %vm32_vm1 = vcmask 261120   ;;  %s415_s1 = inlined_call_operand.vmem [shape: f32[32,128], index: 1, kind: input, shape index: {}]   ;;  %s416_s3 = inlined_call_operand.vmem [shape: f32[128,4], index: 3, kind: input, shape index: {}]   ;;  %s417_s0 = inlined_call_operand.vmem [shape: f32[8,32], index: 0, kind: input, shape index: {}]   ;;  %s418_s2 = inlined_call_operand.vmem [shape: f32[1,128], index: 2, kind: input, shape index: {}]   ;;  %s419_s4 = inlined_call_operand.vmem [shape: f32[1,4], index: 4, kind: input, shape index: {}]   ;;  %s420_s5 = inlined_call_operand.vmem [shape: f32[8,4], index: 5, kind: output, shape index: {}]  }
   0x1   :  { %277 = vmatprep.subr.bf16.mxu0 %v310_v0  ;;  %v21_v1 = vld [vmem:[%s415_s1] sm:$0xff]  ;;  %v22_v2 = vld [vmem:[%s415_s1 + $0x8] sm:$0xff]  ;;  %v23_v3 = vld [vmem:[%s415_s1 + $0x10] sm:$0xff]  ;;  %239 = vmatprep.mubr.msk.f32.mxu0 %vm311_vm0, %v312_v4  ;;  %vm200_vm2 = vcmask 31744  }
   0x2   :  { %v278_v5 = vpack.c.bf16 %v22_v2, %v21_v1  ;;  %v24_v6 = vld [vmem:[%s415_s1 + $0x18] sm:$0xff]  ;;  %283 = vmatprep.subr.bf16.mxu1 %v310_v0  ;;  %v107_v7 = vld [vmem:[%s416_s3] sm:$0xff]  ;;  %274 = vmatprep.mubr.msk.f32.mxu1 %vm311_vm0, %v312_v4  ;;  %v108_v8 = vld [vmem:[%s416_s3 + $0x8] sm:$0xff] }
   0x3   :  { %v109_v9 = vld [vmem:[%s416_s3 + $0x10] sm:$0xff]  ;;  %v110_v10 = vld [vmem:[%s416_s3 + $0x18] sm:$0xff]  ;;  %v281_v11 = vpack.c.bf16 %v24_v6, %v23_v3  ;;  %v284_v12 = vpack.c.bf16 %v108_v8, %v107_v7  ;;  %v111_v14 = vld [vmem:[%s416_s3 + $0x20] sm:$0xff] }
   0x4   :  { %279 = vmatpush3.bf16.msra.mxu0 %v278_v5  ;;  %v287_v13 = vpack.c.bf16 %v110_v10, %v109_v9  ;;  %v112_v15 = vld [vmem:[%s416_s3 + $0x28] sm:$0xff]  ;;  %v20_v16 = vld [vmem:[%s417_s0] sm:$0xff]  ;;  %v113_v18 = vld [vmem:[%s416_s3 + $0x30] sm:$0xff] }
   0x5   :  { %280 = vmatprep.subr.bf16.mxu0 %v310_v0  ;;  %285 = vmatpush3.bf16.msra.mxu1 %v284_v12  ;;  %v290_v17 = vpack.c.bf16 %v112_v15, %v111_v14  ;;  %v114_v19 = vld [vmem:[%s416_s3 + $0x38] sm:$0xff]  ;;  %v115_v21 = vld [vmem:[%s416_s3 + $0x40] sm:$0xff]  ;;  %v116_v22 = vld [vmem:[%s416_s3 + $0x48] sm:$0xff] }
   0x6   :  { %286 = vmatprep.subr.bf16.mxu1 %v310_v0  ;;  %v293_v20 = vpack.c.bf16 %v114_v19, %v113_v18  ;;  %v296_v23 = vpack.c.bf16 %v116_v22, %v115_v21  ;;  %v117_v24 = vld [vmem:[%s416_s3 + $0x50] sm:$0xff]  ;;  %v118_v25 = vld [vmem:[%s416_s3 + $0x58] sm:$0xff]  ;;  %v119_v27 = vld [vmem:[%s416_s3 + $0x60] sm:$0xff] }
   0x7   :  { %v299_v26 = vpack.c.bf16 %v118_v25, %v117_v24  ;;  %v120_v28 = vld [vmem:[%s416_s3 + $0x68] sm:$0xff]  ;;  %v121_v30 = vld [vmem:[%s416_s3 + $0x70] sm:$0xff]  ;;  %v122_v31 = vld [vmem:[%s416_s3 + $0x78] sm:$0xff] }
   0x8   :  { %282 = vmatpush3.bf16.msra.mxu0 %v281_v11  ;;  %v302_v29 = vpack.c.bf16 %v120_v28, %v119_v27  ;;  %v305_v32 = vpack.c.bf16 %v122_v31, %v121_v30  ;;  %v206_v33 = vld [vmem:[%s418_s2] ss:$0 sm:$0xff] }
   0x9   :  { %288 = vmatpush3.bf16.msra.mxu1 %v287_v13  ;;  %v208_v38 = vld [vmem:[%s419_s4] ss:$0 sm:$0xff] }
   0xa   :  { %289 = vmatprep.subr.bf16.mxu1 %v310_v0 }
   0xb   :  { %240 = vmatmul.mubr.msk.f32.vlgmr.msra.gmra.mrb[0].mxu0 %vm32_vm1, %v20_v16 }
   0xd   :  { %291 = vmatpush3.bf16.msra.mxu1 %v290_v17 }
   0xe   :  { %292 = vmatprep.subr.bf16.mxu1 %v310_v0 }
  0x11   :  { %294 = vmatpush3.bf16.msra.mxu1 %v293_v20 }
  0x12   :  { %295 = vmatprep.subr.bf16.mxu1 %v310_v0 }
  0x15   :  { %297 = vmatpush3.bf16.msra.mxu1 %v296_v23 }
  0x16   :  { %298 = vmatprep.subr.bf16.mxu1 %v310_v0 }
  0x19   :  { %300 = vmatpush3.bf16.msra.mxu1 %v299_v26 }
  0x1a   :  { %301 = vmatprep.subr.bf16.mxu1 %v310_v0 }
  0x1d   :  { %303 = vmatpush3.bf16.msra.mxu1 %v302_v29 }
  0x1e   :  { %304 = vmatprep.subr.bf16.mxu1 %v310_v0 }
  0x21   :  { %306 = vmatpush3.bf16.msra.mxu1 %v305_v32 }
  0xde   :  { %v102_v34 = vpop.f32.mrb[0].mxu0 }
  0xdf   :  { %v103_v35 = vadd.f32 %v206_v33, %v102_v34  ;;  %v241_v36 = vpop.f32.mrb[1].mxu0 }
  0xe1   :  { %v106_v37 = vmax.f32 %v103_v35, 0.0 }
  0xe3   :  { %275 = vmatmul.mubr.f32.vlgmr.msra.gmra.mrb[0].mxu1 %v106_v37 }
 0x1b6   :  { %v196_v39 = vpop.f32.mrb[0].mxu1 }
 0x1b7   :  { %v197_v40 = vadd.f32 %v208_v38, %v196_v39  ;;  %v276_v41 = vpop.f32.mrb[1].mxu1 }
 0x1b9   :  { %201 = vst.msk [vmem:[%s420_s5] sm:$0xff] %vm200_vm2, %v197_v40 }

</bundles_post_ra>
